<compile_context>
chip_gen: v5e
topology: v5e:2x2
jax: 0.10.0
libtpu: 0.0.40
codegen_flags: <defaults>
</compile_context>

<pallas_src>
import functools

import numpy as np
import jax
import jax.numpy as jnp
from jax import lax
from jax.experimental import pallas as pl
from jax.experimental.pallas import tpu as pltpu

EPS = 1e-5
_HIGHEST = lax.Precision.HIGHEST


def _mish(x):
    # mish(x) = x * tanh(softplus(x)) = x * (t^2 - 1) / (t^2 + 1),  t = 1 + e^x.
    # Clamp the exponent (the factor is already 1.0 to f32 precision for
    # x >= 20) and use an exact divide -- no approximate EUP reciprocal.
    t = 1.0 + jnp.exp(jnp.minimum(x, 20.0))
    t2 = t * t
    return x * (t2 - 1.0) / (t2 + 1.0)


def _block_stats(o, lane_ok, true_count):
    """Per-batch-block BN partial statistics over the valid lanes.

    o: (C, Lp); lane_ok: (1, Lp) float {0,1}.  Returns the block mean and the
    block-centred M2 (sum of squared deviations from the block mean), which is
    robust to |mean| >> std cancellation.
    """
    inv = 1.0 / float(true_count)
    s1 = jnp.sum(o * lane_ok, axis=1, keepdims=True)           # (C, 1)
    bmean = s1 * inv
    d = (o - bmean) * lane_ok
    m2 = jnp.sum(d * d, axis=1, keepdims=True)                 # (C, 1)
    return bmean, m2


def _finalize_bn(bmean, m2, per_block_count, gamma, beta):
    """Chan's parallel combine of per-block (mean, M2) into BN scale/shift."""
    n = bmean.shape[0]                                          # blocks (=batch)
    mean = jnp.mean(bmean, axis=0)                              # (C, 1)
    tot_m2 = jnp.sum(m2, axis=0) + per_block_count * jnp.sum(
        (bmean - mean) ** 2, axis=0)
    var = tot_m2 / float(n * per_block_count)                   # biased var
    scale = gamma.reshape(-1, 1) * lax.rsqrt(var + EPS)
    shift = beta.reshape(-1, 1) - mean * scale
    return scale.astype(jnp.float32), shift.astype(jnp.float32)


# --------------------------- stage A: squeeze 1x1 ----------------------------
def _squeeze_kernel(x_ref, w_ref, s_ref, m_ref, v_ref, *, true_l):
    # Conv bias omitted: per-channel constants cancel exactly in training BN.
    x = x_ref[0]                                                # (Cin, Lp)
    s = jnp.dot(w_ref[...], x, preferred_element_type=jnp.float32,
                precision=_HIGHEST)                             # (Cs, Lp)
    s_ref[0] = s
    lp = s.shape[1]
    pos = lax.broadcasted_iota(jnp.int32, (1, lp), 1)
    lane_ok = (pos < true_l).astype(jnp.float32)
    bmean, m2 = _block_stats(s, lane_ok, true_l)
    m_ref[0] = bmean
    v_ref[0] = m2


# -------------------- stage B: BN1+Mish, expand 1x1 & 3x3 --------------------
def _expand_kernel(s_ref, sc1_ref, sh1_ref, w1_ref, w3_ref,
                   o_ref, m_ref, v_ref, *, height, width, true_l):
    # BN1 (precomputed scale/shift) + Mish on the squeezed activation.
    s = _mish(s_ref[0] * sc1_ref[...] + sh1_ref[...])           # (Cs, Lp)
    lp = s.shape[1]
    pos = lax.broadcasted_iota(jnp.int32, (1, lp), 1)
    yy = pos // width
    xx = pos % width

    # expand 1x1: one (Ce1, Cs) x (Cs, Lp) MXU matmul.
    o1 = jnp.dot(w1_ref[...], s, preferred_element_type=jnp.float32,
                 precision=_HIGHEST)                            # (Ce1, Lp)

    # expand 3x3 (pad=1): 9-tap masked lane-roll accumulation, no im2col
    # scratch.  Rolls run on the XLU, dots on the MXU; valid destinations never
    # read wrapped/padded lanes because the mask is derived from the
    # destination (y+dy, x+dx) coordinates.
    o3 = jnp.zeros((w3_ref.shape[1], lp), jnp.float32)
    for ky in range(3):
        for kx in range(3):
            dy, dx = ky - 1, kx - 1
            if dy == 0 and dx == 0:
                tap = s
            else:
                shift = (-(dy * width + dx)) % lp
                shifted = pltpu.roll(s, shift=shift, axis=1)
                valid = ((yy + dy >= 0) & (yy + dy < height) &
                         (xx + dx >= 0) & (xx + dx < width))
                tap = jnp.where(valid, shifted, 0.0)
            o3 = o3 + jnp.dot(w3_ref[ky * 3 + kx], tap,
                              preferred_element_type=jnp.float32,
                              precision=_HIGHEST)               # (Ce3, Lp)

    o = jnp.concatenate([o1, o3], axis=0)                       # (Cout, Lp)
    o_ref[0] = o
    lane_ok = (pos < true_l).astype(jnp.float32)
    bmean, m2 = _block_stats(o, lane_ok, true_l)
    m_ref[0] = bmean
    v_ref[0] = m2


# ------------------------ stage C: BN2||BN3 + Mish ---------------------------
def _epilogue_kernel(o_ref, sc_ref, sh_ref, out_ref):
    out_ref[0] = _mish(o_ref[0] * sc_ref[...] + sh_ref[...]).astype(out_ref.dtype)


def fire_forward(x_nchw, params):
    """NCHW in -> NCHW out.  Three batched-grid pallas_calls + tiny BN glue."""
    wsq, bsq, g1, b1, we1, be1, g2, b2, we3, be3, g3, b3 = params
    del bsq, be1, be3                       # conv biases cancel in training BN
    n, cin, h, w = x_nchw.shape
    cs = wsq.shape[1]
    ce1, ce3 = we1.shape[1], we3.shape[3]
    cout = ce1 + ce3
    l = h * w
    lp = ((l + 127) // 128) * 128           # lane-dense last dim

    x = x_nchw.reshape(n, cin, l).astype(jnp.float32)
    if lp != l:
        x = jnp.pad(x, ((0, 0), (0, 0), (0, lp - l)))

    wsq_t = jnp.asarray(wsq.T, jnp.float32)                      # (Cs, Cin)
    w1_t = jnp.asarray(we1.T, jnp.float32)                       # (Ce1, Cs)
    w3_t = jnp.transpose(we3, (0, 1, 3, 2)).reshape(9, ce3, cs).astype(jnp.float32)

    par = pltpu.CompilerParams(dimension_semantics=("parallel",))
    # Per-step footprint is a few MB even at real SqueezeNet sizes, so the
    # default scoped-VMEM limit is fine on v5e/v6e/v7x.

    # ---- stage A: squeeze conv + per-block BN partial stats ----------------
    s_raw, m1, v1 = pl.pallas_call(
        functools.partial(_squeeze_kernel, true_l=l),
        grid=(n,),
        in_specs=[pl.BlockSpec((1, cin, lp), lambda b: (b, 0, 0)),
                  pl.BlockSpec((cs, cin), lambda b: (0, 0))],
        out_specs=[pl.BlockSpec((1, cs, lp), lambda b: (b, 0, 0)),
                   pl.BlockSpec((1, cs, 1), lambda b: (b, 0, 0)),
                   pl.BlockSpec((1, cs, 1), lambda b: (b, 0, 0))],
        out_shape=[jax.ShapeDtypeStruct((n, cs, lp), jnp.float32),
                   jax.ShapeDtypeStruct((n, cs, 1), jnp.float32),
                   jax.ShapeDtypeStruct((n, cs, 1), jnp.float32)],
        compiler_params=par,
    )(x, wsq_t)
    sc1, sh1 = _finalize_bn(m1, v1, l, g1, b1)

    # ---- stage B: BN1+Mish, expand convs + per-block BN partial stats ------
    o_raw, m2p, v2p = pl.pallas_call(
        functools.partial(_expand_kernel, height=h, width=w, true_l=l),
        grid=(n,),
        in_specs=[pl.BlockSpec((1, cs, lp), lambda b: (b, 0, 0)),
                  pl.BlockSpec((cs, 1), lambda b: (0, 0)),
                  pl.BlockSpec((cs, 1), lambda b: (0, 0)),
                  pl.BlockSpec((ce1, cs), lambda b: (0, 0)),
                  pl.BlockSpec((9, ce3, cs), lambda b: (0, 0, 0))],
        out_specs=[pl.BlockSpec((1, cout, lp), lambda b: (b, 0, 0)),
                   pl.BlockSpec((1, cout, 1), lambda b: (b, 0, 0)),
                   pl.BlockSpec((1, cout, 1), lambda b: (b, 0, 0))],
        out_shape=[jax.ShapeDtypeStruct((n, cout, lp), jnp.float32),
                   jax.ShapeDtypeStruct((n, cout, 1), jnp.float32),
                   jax.ShapeDtypeStruct((n, cout, 1), jnp.float32)],
        compiler_params=par,
    )(s_raw, sc1, sh1, w1_t, w3_t)
    sc2, sh2 = _finalize_bn(m2p, v2p, l,
                            jnp.concatenate([g2, g3]), jnp.concatenate([b2, b3]))

    # ---- stage C: BN2||BN3 + final Mish epilogue ---------------------------
    out = pl.pallas_call(
        _epilogue_kernel,
        grid=(n,),
        in_specs=[pl.BlockSpec((1, cout, lp), lambda b: (b, 0, 0)),
                  pl.BlockSpec((cout, 1), lambda b: (0, 0)),
                  pl.BlockSpec((cout, 1), lambda b: (0, 0))],
        out_specs=pl.BlockSpec((1, cout, lp), lambda b: (b, 0, 0)),
        out_shape=jax.ShapeDtypeStruct((n, cout, lp), jnp.float32),
        compiler_params=par,
    )(o_raw, sc2, sh2)

    return out[:, :, :l].reshape(n, cout, h, w)


def init_fire_params(key, in_planes, squeeze1x1, expand1x1, expand3x3):
    ks = jax.random.split(key, 6)
    # conv weights: sign(N(0, 0.01)) exactly as in the module __init__
    wsq = jnp.sign(0.01 * jax.random.normal(ks[0], (in_planes, squeeze1x1), jnp.float32))
    we1 = jnp.sign(0.01 * jax.random.normal(ks[1], (squeeze1x1, expand1x1), jnp.float32))
    we3 = jnp.sign(0.01 * jax.random.normal(ks[2], (3, 3, squeeze1x1, expand3x3), jnp.float32))
    # conv biases: PyTorch default U(-1/sqrt(fan_in), 1/sqrt(fan_in)) -- kept
    # for the reference; they cancel in training-mode BN so the kernel drops them.
    bsq = jax.random.uniform(ks[3], (squeeze1x1,), jnp.float32,
                             -1.0 / np.sqrt(in_planes), 1.0 / np.sqrt(in_planes))
    be1 = jax.random.uniform(ks[4], (expand1x1,), jnp.float32,
                             -1.0 / np.sqrt(squeeze1x1), 1.0 / np.sqrt(squeeze1x1))
    be3 = jax.random.uniform(ks[5], (expand3x3,), jnp.float32,
                             -1.0 / np.sqrt(9 * squeeze1x1), 1.0 / np.sqrt(9 * squeeze1x1))
    # fresh BatchNorm: gamma=1, beta=0
    g1, b1 = jnp.ones((squeeze1x1,), jnp.float32), jnp.zeros((squeeze1x1,), jnp.float32)
    g2, b2 = jnp.ones((expand1x1,), jnp.float32), jnp.zeros((expand1x1,), jnp.float32)
    g3, b3 = jnp.ones((expand3x3,), jnp.float32), jnp.zeros((expand3x3,), jnp.float32)
    return (wsq, bsq, g1, b1, we1, be1, g2, b2, we3, be3, g3, b3)


def fire_reference(x_nchw, params):
    """Pure-JAX (XLA) reference for numerical validation."""
    wsq, bsq, g1, b1, we1, be1, g2, b2, we3, be3, g3, b3 = params
    x = jnp.transpose(x_nchw, (0, 2, 3, 1)).astype(jnp.float32)
    dn = ('NHWC', 'HWIO', 'NHWC')

    def conv(inp, w_hwio, b, pad):
        return lax.conv_general_dilated(inp, w_hwio, (1, 1), pad,
                                        dimension_numbers=dn,
                                        precision=_HIGHEST) + b

    def bn(t, g, b):
        m = jnp.mean(t, axis=(0, 1, 2), keepdims=True)
        v = jnp.mean((t - m) ** 2, axis=(0, 1, 2), keepdims=True)
        return (t - m) * lax.rsqrt(v + EPS) * g + b

    def mish(t):
        return t * jnp.tanh(jnp.maximum(t, 0.0) + jnp.log1p(jnp.exp(-jnp.abs(t))))

    s = conv(x, wsq.reshape(1, 1, *wsq.shape), bsq, 'VALID')
    s = mish(bn(s, g1, b1))
    o1 = bn(conv(s, we1.reshape(1, 1, *we1.shape), be1, 'VALID'), g2, b2)
    o2 = bn(conv(s, we3, be3, 'SAME'), g3, b3)
    out = mish(jnp.concatenate([o1, o2], axis=-1))
    return jnp.transpose(out, (0, 3, 1, 2))


if __name__ == "__main__":
    key = jax.random.PRNGKey(0)
    kx, kp = jax.random.split(key)

    # small shapes consistent with the module: Fire(in_planes=8, squeeze=4, e1=8, e3=8)
    N, Cin, H, W = 2, 8, 16, 16
    squeeze1x1, expand1x1, expand3x3 = 4, 8, 8

    x = jax.random.normal(kx, (N, Cin, H, W), jnp.float32)
    params = init_fire_params(kp, Cin, squeeze1x1, expand1x1, expand3x3)

    out = jax.block_until_ready(fire_forward(x, params))
    ref = jax.block_until_ready(fire_reference(x, params))

    assert out.shape == (N, expand1x1 + expand3x3, H, W), out.shape
    max_err = float(np.max(np.abs(np.asarray(out) - np.asarray(ref))))
    assert np.allclose(np.asarray(out), np.asarray(ref), atol=2e-3, rtol=2e-3), max_err
    print("KERNEL_OK")
</pallas_src>

<mosaic_0001>
module attributes {stable_mosaic.version = 11 : i64} {
  func.func @_squeeze_kernel(%arg0: i32, %arg1: memref<1x8x256xf32, #tpu.memory_space<vmem>>, %arg2: memref<4x8xf32, #tpu.memory_space<vmem>>, %arg3: memref<1x4x256xf32, #tpu.memory_space<vmem>>, %arg4: memref<1x4x1xf32, #tpu.memory_space<vmem>>, %arg5: memref<1x4x1xf32, #tpu.memory_space<vmem>>) attributes {dimension_semantics = [#tpu.dimension_semantics<parallel>], iteration_bounds = array<i64: 2>, scalar_prefetch = 0 : i64, scratch_operands = 0 : i64, tpu.core_type = #tpu.core_type<tc>, window_params = [{transform_indices = @transform_0, window_bounds = array<i64: 1, 8, 256>}, {pipeline_mode = #tpu.pipeline_mode<synchronous>, transform_indices = @transform_1, window_bounds = array<i64: 4, 8>}, {transform_indices = @transform_2, window_bounds = array<i64: 1, 4, 256>}, {transform_indices = @transform_3, window_bounds = array<i64: 1, 4, 1>}, {transform_indices = @transform_4, window_bounds = array<i64: 1, 4, 1>}]} {
    %c0 = arith.constant 0 : index
    %c0_0 = arith.constant 0 : index
    %c0_1 = arith.constant 0 : index
    %0 = vector.load %arg1[%c0, %c0_0, %c0_1] : memref<1x8x256xf32, #tpu.memory_space<vmem>>, vector<1x8x256xf32>
    %1 = vector.shape_cast %0 : vector<1x8x256xf32> to vector<8x256xf32>
    %c0_2 = arith.constant 0 : index
    %c0_3 = arith.constant 0 : index
    %2 = vector.load %arg2[%c0_2, %c0_3] : memref<4x8xf32, #tpu.memory_space<vmem>>, vector<4x8xf32>
    %cst = arith.constant dense<0.000000e+00> : vector<4x256xf32>
    %3 = tpu.matmul %2, %1, %cst {dimension_numbers = #tpu.dot_dimension_numbers<[1], [0], [0], [1], [0, 0, 1, 1], [], []>, precision = #tpu.contract_precision<fp32>} : vector<4x8xf32>, vector<8x256xf32>, vector<4x256xf32> -> vector<4x256xf32>
    %c0_4 = arith.constant 0 : index
    %c0_5 = arith.constant 0 : index
    %c0_6 = arith.constant 0 : index
    %4 = vector.load %arg3[%c0_4, %c0_5, %c0_6] : memref<1x4x256xf32, #tpu.memory_space<vmem>>, vector<1x4x256xf32>
    %5 = vector.shape_cast %4 : vector<1x4x256xf32> to vector<4x256xf32>
    %6 = vector.shape_cast %3 : vector<4x256xf32> to vector<1x4x256xf32>
    tpu.vector_store %arg3[%c0_4, %c0_5, %c0_6], %6 {strides = array<i32>} : memref<1x4x256xf32, #tpu.memory_space<vmem>>, vector<1x4x256xf32>,
    %7 = tpu.iota {dimensions = array<i32: 1>} : vector<1x256xi32>
    %c256_i32 = arith.constant 256 : i32
    %8 = vector.broadcast %c256_i32 : i32 to vector<1x256xi32>
    %9 = arith.cmpi slt, %7, %8 : vector<1x256xi32>
    %10 = arith.extui %9 : vector<1x256xi1> to vector<1x256xi32>
    %11 = arith.sitofp %10 : vector<1x256xi32> to vector<1x256xf32>
    %12 = vector.broadcast %11 : vector<1x256xf32> to vector<4x256xf32>
    %13 = arith.mulf %3, %12 : vector<4x256xf32>
    %cst_7 = arith.constant dense<0.000000e+00> : vector<4xf32>
    %14 = vector.multi_reduction <add>, %13, %cst_7 [1] : vector<4x256xf32> to vector<4xf32>
    %15 = vector.shape_cast %14 : vector<4xf32> to vector<4x1xf32>
    %cst_8 = arith.constant 3.906250e-03 : f32
    %16 = vector.broadcast %cst_8 : f32 to vector<4x1xf32>
    %17 = arith.mulf %15, %16 : vector<4x1xf32>
    %18 = vector.broadcast %17 : vector<4x1xf32> to vector<4x256xf32>
    %19 = arith.subf %3, %18 : vector<4x256xf32>
    %20 = vector.broadcast %11 : vector<1x256xf32> to vector<4x256xf32>
    %21 = arith.mulf %19, %20 : vector<4x256xf32>
    %22 = arith.mulf %21, %21 : vector<4x256xf32>
    %cst_9 = arith.constant dense<0.000000e+00> : vector<4xf32>
    %23 = vector.multi_reduction <add>, %22, %cst_9 [1] : vector<4x256xf32> to vector<4xf32>
    %24 = vector.shape_cast %23 : vector<4xf32> to vector<4x1xf32>
    %c0_10 = arith.constant 0 : index
    %c0_11 = arith.constant 0 : index
    %c0_12 = arith.constant 0 : index
    %25 = vector.load %arg4[%c0_10, %c0_11, %c0_12] : memref<1x4x1xf32, #tpu.memory_space<vmem>>, vector<1x4x1xf32>
    %26 = vector.shape_cast %25 : vector<1x4x1xf32> to vector<4x1xf32>
    %27 = vector.shape_cast %17 : vector<4x1xf32> to vector<1x4x1xf32>
    tpu.vector_store %arg4[%c0_10, %c0_11, %c0_12], %27 {strides = array<i32>} : memref<1x4x1xf32, #tpu.memory_space<vmem>>, vector<1x4x1xf32>,
    %c0_13 = arith.constant 0 : index
    %c0_14 = arith.constant 0 : index
    %c0_15 = arith.constant 0 : index
    %28 = vector.load %arg5[%c0_13, %c0_14, %c0_15] : memref<1x4x1xf32, #tpu.memory_space<vmem>>, vector<1x4x1xf32>
    %29 = vector.shape_cast %28 : vector<1x4x1xf32> to vector<4x1xf32>
    %30 = vector.shape_cast %24 : vector<4x1xf32> to vector<1x4x1xf32>
    tpu.vector_store %arg5[%c0_13, %c0_14, %c0_15], %30 {strides = array<i32>} : memref<1x4x1xf32, #tpu.memory_space<vmem>>, vector<1x4x1xf32>,
    return
  }
  func.func @transform_0(%arg0: i32) -> (i32, i32, i32) {
    %c0_i32 = arith.constant 0 : i32
    %c0_i32_0 = arith.constant 0 : i32
    %c0_i32_1 = arith.constant 0 : i32
    return %arg0, %c0_i32, %c0_i32_0 : i32, i32, i32
  }
  func.func @transform_1(%arg0: i32) -> (i32, i32) {
    %c0_i32 = arith.constant 0 : i32
    %c0_i32_0 = arith.constant 0 : i32
    %c0_i32_1 = arith.constant 0 : i32
    return %c0_i32, %c0_i32_0 : i32, i32
  }
  func.func @transform_2(%arg0: i32) -> (i32, i32, i32) {
    %c0_i32 = arith.constant 0 : i32
    %c0_i32_0 = arith.constant 0 : i32
    %c0_i32_1 = arith.constant 0 : i32
    return %arg0, %c0_i32, %c0_i32_0 : i32, i32, i32
  }
  func.func @transform_3(%arg0: i32) -> (i32, i32, i32) {
    %c0_i32 = arith.constant 0 : i32
    %c0_i32_0 = arith.constant 0 : i32
    %c0_i32_1 = arith.constant 0 : i32
    return %arg0, %c0_i32, %c0_i32_0 : i32, i32, i32
  }
  func.func @transform_4(%arg0: i32) -> (i32, i32, i32) {
    %c0_i32 = arith.constant 0 : i32
    %c0_i32_0 = arith.constant 0 : i32
    %c0_i32_1 = arith.constant 0 : i32
    return %arg0, %c0_i32, %c0_i32_0 : i32, i32, i32
  }
}

</mosaic_0001>

<bundles_post_ra>
// kernel: tpu_custom_call.1
= control target key start
LH: loop header
LB: loop body
LE: loop exit
PB: predicated region body
PF: predicated region fallthrough
CT: control target
= control target key end

     0   :  { %10 = vsyncpa [#allocation3], 0  ;;  %s1142_s0 = inlined_call_operand.hbm [shape: f32[2,8,256], index: 0, kind: input, shape index: {}]   ;;  %s1143_s1 = inlined_call_operand.hbm [shape: f32[4,8], index: 1, kind: input, shape index: {}]   ;;  %s1144_s2 = inlined_call_operand.hbm [shape: f32[2,4,256], index: 2, kind: output, shape index: {0}]   ;;  %s1145_s3 = inlined_call_operand.vmem [shape: f32[2,4,1], index: 3, kind: output, shape index: {1}]   ;;  %s1146_s4 = inlined_call_operand.vmem [shape: f32[2,4,1], index: 4, kind: output, shape index: {2}]  }
   0x1   :  { %12 = vsyncpa [#allocation3 + $0x1], 0 }
   0x2   :  { %13 = vsyncpa [#allocation6], 0 }
   0x3   :  { %14 = vsyncpa [#allocation4], 0 }
   0x4   :  { %16 = vsyncpa [#allocation4 + $0x1], 0  ;;  %s983_s15 = smov 0   ;;  %s985_s16 = smov 0  }
   0x5   :  { %s987_s17 = smov 0   ;;  %s989_s18 = smov 0  }
   0x6 LB: > { %s1004_s19 = sadd.s32 4294967295, %s955_s18   ;;  %s748_s20 = sadd.s32 4294967294, %s955_s18   ;;  %s955_s18 = sphi %s989_s18, %s1156_s18   ;;  %s951_s17 = sphi %s987_s17, %s1155_s17   ;;  %s947_s16 = sphi %s985_s16, %s1154_s16   ;;  %s943_s15 = sphi %s983_s15, %s1153_s15  }
   0x7   : > { %p42_p0 = scmp.ne.s32.totalorder %s947_s16, %s943_s15  ;;  %p43_p1 = scmp.eq.s32.totalorder %s1004_s19, 0 }
   0x8   : > { %p87_p2 = scmp.eq.s32.totalorder %s1004_s19, 1  ;;  %p93_p3 = scmp.eq.s32.totalorder %s748_s20, 1 }
   0x9   : > { %p1013_p4 = por %p43_p1, %p42_p0  ;;  %p749_p5 = scmp.ge.s32.totalorder %s955_s18, 1 }
   0xa   : > { %p1018_p6 = por %p93_p3, %p42_p0  ;;  %p152_p7 = scmp.lt.s32.totalorder %s955_s18, 3 }
   0xb   : > { %s164_s25 = sshll.u32 %s1143_s1, 4  ;;  %s957_s27 = smov [#allocation5]   ;;  %s165_s25 = int_to_ptr.hbm [resolvable:$true] %s164_s25 }
   0xc   : > { %p1026_p8 = pnand %p749_p5, %p152_p7  ;;  %s166_s28 = sshll.u32 %s957_s27, 4  ;;  %s167_s28 = int_to_ptr.vmem [resolvable:$true] %s166_s28 }
   0xd   : > { %s1036_s29 = sadd.s32 1, %s955_s18   ;;  %s29_s30 = sadd.s32 1, %s951_s17 }
   0xe   : > { %p776_p10 = pneg %p1026_p8  ;;  %s26_s5 = ssub.s32 %s955_s18, %s1036_s29 }
   0xf   : > { %p27_p12 = scmp.eq.s32.totalorder %s26_s5, 0  ;;  %p36_p13 = scmp.ne.s32.totalorder %s951_s17, %s947_s16 }
  0x10   : > { %p777_p11 = pnand %p776_p10, %p43_p1  ;;  %p37_p0 = scmp.eq.s32.totalorder %s955_s18, 0 }
  0x11   : > { %s1045_s6 = scalar_select %p27_p12, %s951_s17, %s29_s30  }
  0x12   : > { %779 = dma.hbm_to_vmem [thread:$0]  (!%p777_p11), %s165_s25, 64, %s167_s28, [#allocation6]  }
  0x13   : > { %p1049_p3 = por %p87_p2, %p36_p13  ;;  %p789_p5 = scmp.lt.s32.totalorder %s955_s18, 2 }
  0x14   : > { %s177_s8 = sand.u32 1, %s951_s17   ;;  %s766_s9 = sshll.u32 %s955_s18, 4 }
  0x15   : > { %p38_p7 = por %p37_p0, %p36_p13  ;;  %s752_s10 = sshll.u32 %s177_s8, 4 }
  0x16   : > { %s186_s13 = scalar_lea.hbm %s1142_s0, %s766_s9  ;;  %s181_s20 = scalar_lea.vmem [#allocation2], %s752_s10 }
  0x17   : > { %s188_s14 = sshll.u32 %s186_s13, 4  ;;  %s190_s23 = sshll.u32 %s181_s20, 4  ;;  %s189_s14 = int_to_ptr.hbm [resolvable:$true] %s188_s14  ;;  %s191_s23 = int_to_ptr.vmem [resolvable:$true] %s190_s23 }
  0x18   : > { %p1059_p10 = pnand %p789_p5, %p38_p7  ;;  %s178_s25 = scalar_lea.sflag [#allocation3], %s177_s8 }
  0x19   : > { %s855_s27 = sshra.s32 %s189_s14, 4  ;;  %s862_s9 = scalar_lea.hbm %s1142_s0, 32  ;;  %s856_s27 = int_to_ptr.hbm [resolvable:$true] %s855_s27 }
  0x1a   : > { %s857_s28 = scalar_lea.hbm %s856_s27, 16  ;;  %p859_p11 = pneg %p1059_p10 }
  0x1b   : > { %p858_p2 = scmp.ne.s32.totalorder %s856_s27, %s857_s28  ;;  %p863_p0 = scmp.lt.s32.totalorder %s856_s27, %s1142_s0 }
  0x1c   : > { %p864_p5 = scmp.lt.s32.totalorder %s862_s9, %s857_s28 }
  0x1d   : > { %p860_p12 = pnand %p859_p11, %p858_p2 }
  0x1e   : > { %p865_p7 = por %p864_p5, %p863_p0 }
  0x1f   : > { %p861_p13 = pneg %p860_p12 }
  0x21   : > { %p866_p9 = pnand %p865_p7, %p861_p13 }
  0x23   : > { %869 = shalt.err (!%p866_p9)
}
  0x24   : > { %783 = dma.hbm_to_vmem [thread:$0]  (!%p1059_p10), %s189_s14, 256, %s191_s23, %s178_s25  }
  0x25   : > { %199 = sbr.rel (%p1026_p8) target bundleno = 453 (0x1c5), region = 28  ;;  %s1076_s8 = sand.u32 (!%p1026_p8), 1, %s947_s16  }
  0x26   : > { %s756_s12 = sshll.u32 (!%p1026_p8), %s1076_s8, 4  ;;  %s202_s13 = scalar_lea.sflag (!%p1026_p8), [#allocation3], %s1076_s8 }
  0x27   : > { %s205_s20 = scalar_lea.vmem (!%p1026_p8), [#allocation2], %s756_s12 }
  0x2a   : > { %930 = dma.done.wait (%p1013_p4), %s202_s13, 256  }
  0x2b   : > { %932 = vsyncadd (%p1013_p4), %s202_s13, 4294967040 }
  0x2c   : > { %934 = dma.done.wait (%p43_p1), [#allocation6], 64  }
  0x2d   : > { %936 = vsyncadd (%p43_p1), [#allocation6], 4294967232  ;;  %vm255_vm0 = vcmask 64512   ;;  %v252_v0 = vld [vmem:[%s205_s20] sm:$0xff]  ;;  %v253_v2 = vld [vmem:[%s205_s20 + $0x8] sm:$0xff]  ;;  %vm554_vm1 = vcmask 1043456  }
  0x2e   : > { %v254_v1 = vld [vmem:[#allocation5] sm:$0xf]  ;;  %v274_v3 = vand.u32 4294901760, %v252_v0  ;;  %v420_v5 = vand.u32 4294901760, %v253_v2  ;;  %s758_s21 = sshll.u32 %s1076_s8, 3  ;;  %p244_p1 = scmp.lt.s32.totalorder %s1004_s19, 1 }
  0x2f   : > { %v257_v4 = vsel %vm255_vm0, %v254_v1, 0  ;;  %s231_s26 = scalar_lea.vmem [#allocation7], %s758_s21  ;;  %s767_s23 = sshll.u32 %s1004_s19, 3 }
  0x30   : > { %v276_v6 = vand.u32 4294901760, %v257_v4  ;;  %v301_v7 = vsub.f32 %v252_v0, %v274_v3  ;;  %351 = vmatpush.msra.mxu3 %v274_v3  ;;  %275 = vmatpush.msra.mxu0 %v274_v3  ;;  %v447_v8 = vsub.f32 %v253_v2, %v420_v5  ;;  %s1094_s14 = scalar_select %p244_p1, %s1004_s19, 1 }
  0x31   : > { %s609_s28 = scalar_lea.hbm %s1144_s2, %s767_s23  ;;  %s611_s30 = sshll.u32 %s231_s26, 4  ;;  %s612_s30 = int_to_ptr.vmem [resolvable:$true] %s611_s30 }
  0x32   : > { %v277_v9 = vsub.f32 %v257_v4, %v276_v6  ;;  %328 = vmatpush.msra.mxu2 %v301_v7  ;;  %v302_v10 = vand.u32 4294901760, %v301_v7  ;;  %v448_v11 = vand.u32 4294901760, %v447_v8  ;;  %s759_s24 = sshll.u32 %s1094_s14, 2  ;;  %s613_s5 = sshll.u32 %s609_s28, 4  ;;  %s614_s5 = int_to_ptr.hbm [resolvable:$true] %s613_s5 }
  0x33   : > { %s590_s9 = scalar_lea.sflag [#allocation4], %s1076_s8  ;;  %s899_s10 = sshra.s32 %s614_s5, 4  ;;  %s900_s10 = int_to_ptr.hbm [resolvable:$true] %s899_s10 }
  0x34   : > { %331 = vmatmul.f32.vlgmr.msra.gmra.mxu2 %v277_v9  ;;  %v278_v12 = vand.u32 4294901760, %v277_v9  ;;  %v303_v13 = vsub.f32 %v301_v7, %v302_v10  ;;  %377 = vmatpush.msrb.mxu0 %v302_v10  ;;  %v449_v14 = vsub.f32 %v447_v8, %v448_v11  ;;  %s901_s11 = scalar_lea.hbm %s900_s10, 8  ;;  %s905_s19 = scalar_lea.hbm %s1144_s2, 16 }
  0x35   : > { %421 = vmatpush.msrb.mxu2 %v420_v5  ;;  %p902_p4 = scmp.ne.s32.totalorder %s900_s10, %s901_s11  ;;  %p906_p10 = scmp.lt.s32.totalorder %s900_s10, %s1144_s2 }
  0x36   : > { %355 = vmatmul.f32.vlgmr.msra.gmra.mxu3 %v278_v12  ;;  %v279_v15 = vsub.f32 %v277_v9, %v278_v12  ;;  %v304_v16 = vand.u32 4294901760, %v303_v13  ;;  %v450_v17 = vand.u32 4294901760, %v449_v14  ;;  %p907_p2 = scmp.lt.s32.totalorder %s905_s19, %s901_s11 }
  0x37   : > { %523 = vmatpush.msra.mxu2 %v448_v11  ;;  %p903_p8 = pnand %p902_p4, %p1049_p3 }
  0x38   : > { %v280_v18 = vand.u32 4294901760, %v279_v15  ;;  %305 = vmatpush.msra.mxu1 %v304_v16  ;;  %451 = vmatpush.msrb.mxu3 %v450_v17  ;;  %p908_p11 = por %p907_p2, %p906_p10 }
  0x39   : > { %307 = vmatmul.f32.vlgmr.msra.gmra.mxu1 %v276_v6  ;;  %p904_p9 = pneg %p903_p8 }
  0x3a   : > { %281 = vmatmul.f32.vlgmr.msra.gmra.mxu0 %v280_v18  ;;  %399 = vmatpush.msrb.mxu1 %v274_v3 }
  0x3b   : > { %474 = vmatpush.msra.mxu0 %v447_v8  ;;  %545 = vmatpush.msra.mxu3 %v420_v5  ;;  %p909_p12 = pnand %p908_p11, %p904_p9 }
  0x3c   : > { %427 = vmatmul.f32.vlgmr.msrb.gmra.mxu2 %v280_v18  ;;  %497 = vmatpush.msra.mxu1 %v420_v5 }
  0x3e   : > { %453 = vmatmul.f32.vlgmr.msrb.gmra.mxu3 %v276_v6 }
  0x41   : > { %401 = vmatmul.f32.vlgmr.msrb.gmra.mxu1 %v276_v6 }
  0x42   : > { %379 = vmatmul.f32.vlgmr.msrb.gmra.mxu0 %v276_v6 }
  0x44   : > { %525 = vmatmul.f32.vlgmr.msra.gmra.mxu2 %v276_v6 }
  0x46   : > { %547 = vmatmul.f32.vlgmr.msra.gmra.mxu3 %v276_v6 }
  0x49   : > { %501 = vmatmul.f32.vlgmr.msra.gmra.mxu1 %v278_v12 }
  0x4a   : > { %477 = vmatmul.f32.vlgmr.msra.gmra.mxu0 %v277_v9 }
  0xb6   : > { %v308_v20 = vpop.f32.mrf.mxu1 }
  0xb7   : > { %v282_v19 = vpop.f32.mrf.mxu0  ;;  %v332_v21 = vpop.f32.mrf.mxu2 }
  0xb8   : > { %v309_v23 = vadd.f32 %v308_v20, %v282_v19 }
  0xb9   : > { %v356_v22 = vpop.f32.mrf.mxu3 }
  0xba   : > { %v333_v27 = vadd.f32 %v332_v21, %v309_v23 }
  0xbc   : > { %v357_v29 = vadd.f32 %v356_v22, %v333_v27 }
  0xbe   : > { %v402_v25 = vpop.f32.mrf.mxu1 }
  0xbf   : > { %v380_v24 = vpop.f32.mrf.mxu0  ;;  %v428_v26 = vpop.f32.mrf.mxu2 }
  0xc0   : > { %v381_v33 = vadd.f32 %v380_v24, %v357_v29 }
  0xc1   : > { %v454_v28 = vpop.f32.mrf.mxu3 }
  0xc2   : > { %v455_v30 = vadd.f32 %v454_v28, %v428_v26  ;;  %v403_v38 = vadd.f32 %v402_v25, %v381_v33 }
  0xc4   : > { %v569_v42 = vsel %vm554_vm1, %v403_v38, 0.0 }
  0xc6   : > { %v502_v32 = vpop.f32.mrf.mxu1 }
  0xc7   : > { %v478_v31 = vpop.f32.mrf.mxu0  ;;  %v526_v35 = vpop.f32.mrf.mxu2 }
  0xc8   : > { %v479_v34 = vadd.f32 %v478_v31, %v455_v30 }
  0xc9   : > { %v548_v37 = vpop.f32.mrf.mxu3 }
  0xca   : > { %v503_v36 = vadd.f32 %v502_v32, %v479_v34 }
  0xcc   : > { %v527_v39 = vadd.f32 %v526_v35, %v503_v36 }
  0xce   : > { %v549_v40 = vadd.f32 %v548_v37, %v527_v39 }
  0xd0   : > { %v553_v41 = vrot.slane %v549_v40, 4  ;;  %v570_v43 = vsel %vm554_vm1, %v549_v40, 0.0 }
  0xd1   : > { %v571_v44 = vadd.f32 %v570_v43, %v569_v42 }
  0xd2   : > { %v555_v45 = vsel %vm554_vm1, %v403_v38, %v553_v41 }
  0xd3   : > { %572 = vadd.xlane.f32.xlu0 %v571_v44  ;;  %557 = vst [vmem:[%s231_s26] sm:$0xff] %v555_v45 }
  0xd4   : > { %912 = shalt.err (!%p909_p12)
}
  0xd5   : > { %774 = dma.vmem_to_hbm [thread:$0]  (%p1049_p3), %s612_s30, 128, %s614_s5, %s590_s9   ;;  %vm586_vm2 = vcmask 3072  }
  0xd6   : > { %s247_s23 = scalar_lea.vmem %s1145_s3, %s759_s24  ;;  %s251_s27 = scalar_lea.vmem %s1146_s4, %s759_s24 }
 0x146   : > { %v573_v46 = vpop.xlane.xlu0 %572 }
 0x147   : > { %v574_v47 = vmul.f32 0.00390625, %v573_v46 }
 0x149   : > { %v575_v48 = vsub.f32 %v403_v38, %v574_v47  ;;  %v576_v49 = vsub.f32 %v549_v40, %v574_v47  ;;  %587 = vst.msk [vmem:[%s247_s23] sm:$0xf] %vm586_vm2, %v574_v47 }
 0x14b   : > { %v579_v50 = vmul.f32 %v575_v48, %v575_v48  ;;  %v580_v51 = vmul.f32 %v576_v49, %v576_v49 }
 0x14d   : > { %v581_v52 = vsel %vm554_vm1, %v579_v50, 0.0  ;;  %v582_v53 = vsel %vm554_vm1, %v580_v51, 0.0 }
 0x14e   : > { %v583_v54 = vadd.f32 %v582_v53, %v581_v52 }
 0x150   : > { %584 = vadd.xlane.f32.xlu0 %v583_v54 }
 0x1c3   : > { %v585_v55 = vpop.xlane.xlu0 %584 }
 0x1c4   : > { %588 = vst.msk [vmem:[%s251_s27] sm:$0xf] %vm586_vm2, %v585_v55 }
 0x1c5 PF: > { %s631_s28 = sand.u32 1, %s943_s15   ;;  %p1152_p3 = scmp.ge.s32.totalorder %s955_s18, 2 }
 0x1c6   : > { %s632_s30 = scalar_lea.sflag [#allocation4], %s631_s28 }
 0x1c7   : > { %p785_p13 = pnand %p1152_p3, %p1018_p6 }
 0x1c9   : > { %p786_p0 = pneg %p785_p13 }
 0x1cb   : > { %938 = dma.done.wait (%p786_p0), %s632_s30, 128  }
 0x1cc   : > { %940 = vsyncadd (%p786_p0), %s632_s30, 4294967168  ;;  %p19_p5 = scmp.ge.s32.totalorder %s1036_s29, 4   ;;  %s1153_s15 = smov %s947_s16 }
 0x1cd   : > { %s1154_s16 = smov %s951_s17  ;;  %s1155_s17 = smov %s1045_s6 }
 0x1ce   : > { %s1156_s18 = smov %s1036_s29  ;;  %21 = sbr.rel (!%p19_p5) target bundleno = 6 (0x6), region = 101 }
 0x1d3   :  { %652 = vsyncpa [#allocation3], 1 }
 0x1d4   :  { %654 = vsyncpa [#allocation3 + $0x1], 1 }
 0x1d5   :  { %655 = vsyncpa [#allocation6], 1 }
 0x1d6   :  { %656 = vsyncpa [#allocation4], 1 }
 0x1d7   :  { %658 = vsyncpa [#allocation4 + $0x1], 1 }

</bundles_post_ra>
